<compile_context>
chip_gen: v7x
topology: tpu7x:2x2x1
jax: 0.10.0
libtpu: 0.0.40
codegen_flags: <defaults>
</compile_context>

<pallas_src>
import functools

import jax
import jax.numpy as jnp
from jax.experimental import pallas as pl
from jax.experimental.pallas import tpu as pltpu


def _actor_kernel(x_ref,
                  w1_ref, b1_ref,
                  w2_ref, b2_ref,
                  w3_ref, b3_ref,
                  w4_ref, b4_ref,
                  out_ref,
                  *, max_action):
    """Whole 4-layer MLP for one batch tile, fully fused in VMEM."""
    x = x_ref[...].astype(jnp.float32)

    # fc1 + ReLU
    h = jnp.dot(x, w1_ref[...].astype(jnp.float32),
                preferred_element_type=jnp.float32)
    h = jnp.maximum(h + b1_ref[...].astype(jnp.float32), 0.0)
    # fc2 + ReLU
    h = jnp.dot(h, w2_ref[...].astype(jnp.float32),
                preferred_element_type=jnp.float32)
    h = jnp.maximum(h + b2_ref[...].astype(jnp.float32), 0.0)
    # fc3 + ReLU
    h = jnp.dot(h, w3_ref[...].astype(jnp.float32),
                preferred_element_type=jnp.float32)
    h = jnp.maximum(h + b3_ref[...].astype(jnp.float32), 0.0)
    # action_out + tanh, scaled by max_action
    logits = jnp.dot(h, w4_ref[...].astype(jnp.float32),
                     preferred_element_type=jnp.float32)
    logits = logits + b4_ref[...].astype(jnp.float32)
    out_ref[...] = (max_action * jnp.tanh(logits)).astype(out_ref.dtype)


def actor_forward(x, params, max_action, *, batch_tile=512):
    """Run the Actor MLP forward pass as a batch-tiled Pallas TPU kernel.

    x:       [batch, obs_dim] float32
    params:  dict with w1..w4 ([in, out]) and b1..b4 ([1, out]) (f32 or bf16)
    returns: [batch, action_dim] float32
    """
    batch, obs_dim = x.shape
    action_dim = params["w4"].shape[1]

    # Batch tile: sublane-aligned (multiple of 8), capped at `batch_tile`.
    tb = min(batch_tile, max(8, ((batch + 7) // 8) * 8))
    tb = ((tb + 7) // 8) * 8
    padded = ((batch + tb - 1) // tb) * tb
    if padded != batch:
        x = jnp.pad(x, ((0, padded - batch), (0, 0)))

    grid = (padded // tb,)

    def resident_spec(arr):
        # Full-array block with a constant index_map: stays VMEM-resident
        # across grid steps (weights/biases DMA'd from HBM only once).
        return pl.BlockSpec(arr.shape, lambda i: (0,) * arr.ndim)

    weight_keys = ("w1", "b1", "w2", "b2", "w3", "b3", "w4", "b4")
    in_specs = [pl.BlockSpec((tb, obs_dim), lambda i: (i, 0))] + [
        resident_spec(params[k]) for k in weight_keys
    ]

    kernel = functools.partial(_actor_kernel, max_action=float(max_action))

    out = pl.pallas_call(
        kernel,
        out_shape=jax.ShapeDtypeStruct((padded, action_dim), jnp.float32),
        grid=grid,
        in_specs=in_specs,
        out_specs=pl.BlockSpec((tb, action_dim), lambda i: (i, 0)),
        compiler_params=pltpu.CompilerParams(
            dimension_semantics=("parallel",),   # megacore on v7x
            vmem_limit_bytes=8 << 20,
        ),
    )(x, *[params[k] for k in weight_keys])

    return out[:batch] if padded != batch else out


def init_actor_params(key, obs_dim, action_dim, *, weight_dtype=jnp.bfloat16):
    """PyTorch-style init U(-1/sqrt(fan_in), 1/sqrt(fan_in)); bf16 storage."""
    dims = [(obs_dim, 128), (128, 64), (64, 32), (32, action_dim)]
    params = {}
    keys = jax.random.split(key, 2 * len(dims))
    for i, (fan_in, fan_out) in enumerate(dims):
        bound = 1.0 / (fan_in ** 0.5)
        w = jax.random.uniform(keys[2 * i], (fan_in, fan_out),
                               minval=-bound, maxval=bound,
                               dtype=jnp.float32).astype(weight_dtype)
        b = jax.random.uniform(keys[2 * i + 1], (1, fan_out),
                               minval=-bound, maxval=bound,
                               dtype=jnp.float32).astype(weight_dtype)
        params[f"w{i + 1}"] = w
        params[f"b{i + 1}"] = b
    return params


def actor_reference(x, params, max_action):
    """Pure-JAX reference for correctness checking (same bf16 param values)."""
    def f32(a):
        return a.astype(jnp.float32)
    h = jnp.maximum(x @ f32(params["w1"]) + f32(params["b1"]), 0.0)
    h = jnp.maximum(h @ f32(params["w2"]) + f32(params["b2"]), 0.0)
    h = jnp.maximum(h @ f32(params["w3"]) + f32(params["b3"]), 0.0)
    return max_action * jnp.tanh(h @ f32(params["w4"]) + f32(params["b4"]))


if __name__ == "__main__":
    # Shapes consistent with the module: obs_shape=16, action_shape=8.
    obs_dim, action_dim = 16, 8
    max_action = 1.0  # args.high_action

    key = jax.random.PRNGKey(0)
    k_params, k_x1, k_x2 = jax.random.split(key, 3)
    params = init_actor_params(k_params, obs_dim, action_dim)

    # Small-batch case (batch=2): padded to one 8-row tile internally.
    x_small = jax.random.normal(k_x1, (2, obs_dim), dtype=jnp.float32)
    out_small = jax.block_until_ready(actor_forward(x_small, params, max_action))
    ref_small = actor_reference(x_small, params, max_action)
    assert out_small.shape == (2, action_dim)
    assert jnp.allclose(out_small, ref_small, atol=2e-5, rtol=2e-5), \
        "small-batch mismatch vs reference"

    # Larger, non-multiple-of-tile batch: exercises the multi-step pipelined
    # grid with VMEM-resident weights and output slicing of batch padding.
    x_big = jax.random.normal(k_x2, (300, obs_dim), dtype=jnp.float32)
    out_big = jax.block_until_ready(
        actor_forward(x_big, params, max_action, batch_tile=128))
    ref_big = actor_reference(x_big, params, max_action)
    assert out_big.shape == (300, action_dim)
    assert jnp.allclose(out_big, ref_big, atol=2e-5, rtol=2e-5), \
        "large-batch mismatch vs reference"

    print("KERNEL_OK")
</pallas_src>

<mosaic_0001>
module attributes {stable_mosaic.version = 11 : i64} {
  func.func @_actor_kernel(%arg0: i32, %arg1: memref<8x16xf32, #tpu.memory_space<vmem>>, %arg2: memref<16x128xbf16, #tpu.memory_space<vmem>>, %arg3: memref<1x128xbf16, #tpu.memory_space<vmem>>, %arg4: memref<128x64xbf16, #tpu.memory_space<vmem>>, %arg5: memref<1x64xbf16, #tpu.memory_space<vmem>>, %arg6: memref<64x32xbf16, #tpu.memory_space<vmem>>, %arg7: memref<1x32xbf16, #tpu.memory_space<vmem>>, %arg8: memref<32x8xbf16, #tpu.memory_space<vmem>>, %arg9: memref<1x8xbf16, #tpu.memory_space<vmem>>, %arg10: memref<8x8xf32, #tpu.memory_space<vmem>>) attributes {dimension_semantics = [#tpu.dimension_semantics<parallel>], iteration_bounds = array<i64: 1>, scalar_prefetch = 0 : i64, scratch_operands = 0 : i64, tpu.core_type = #tpu.core_type<tc>, window_params = [{transform_indices = @transform_0, window_bounds = array<i64: 8, 16>}, {pipeline_mode = #tpu.pipeline_mode<synchronous>, transform_indices = @transform_1, window_bounds = array<i64: 16, 128>}, {pipeline_mode = #tpu.pipeline_mode<synchronous>, transform_indices = @transform_2, window_bounds = array<i64: 1, 128>}, {pipeline_mode = #tpu.pipeline_mode<synchronous>, transform_indices = @transform_3, window_bounds = array<i64: 128, 64>}, {pipeline_mode = #tpu.pipeline_mode<synchronous>, transform_indices = @transform_4, window_bounds = array<i64: 1, 64>}, {pipeline_mode = #tpu.pipeline_mode<synchronous>, transform_indices = @transform_5, window_bounds = array<i64: 64, 32>}, {pipeline_mode = #tpu.pipeline_mode<synchronous>, transform_indices = @transform_6, window_bounds = array<i64: 1, 32>}, {pipeline_mode = #tpu.pipeline_mode<synchronous>, transform_indices = @transform_7, window_bounds = array<i64: 32, 8>}, {pipeline_mode = #tpu.pipeline_mode<synchronous>, transform_indices = @transform_8, window_bounds = array<i64: 1, 8>}, {transform_indices = @transform_9, window_bounds = array<i64: 8, 8>}]} {
    %c0 = arith.constant 0 : index
    %c0_0 = arith.constant 0 : index
    %0 = vector.load %arg1[%c0, %c0_0] : memref<8x16xf32, #tpu.memory_space<vmem>>, vector<8x16xf32>
    %c0_1 = arith.constant 0 : index
    %c0_2 = arith.constant 0 : index
    %1 = vector.load %arg2[%c0_1, %c0_2] : memref<16x128xbf16, #tpu.memory_space<vmem>>, vector<16x128xbf16>
    %2 = arith.extf %1 : vector<16x128xbf16> to vector<16x128xf32>
    %cst = arith.constant dense<0.000000e+00> : vector<8x128xf32>
    %3 = tpu.matmul %0, %2, %cst {dimension_numbers = #tpu.dot_dimension_numbers<[1], [0], [0], [1], [0, 0, 1, 1], [], []>} : vector<8x16xf32>, vector<16x128xf32>, vector<8x128xf32> -> vector<8x128xf32>
    %c0_3 = arith.constant 0 : index
    %c0_4 = arith.constant 0 : index
    %4 = vector.load %arg3[%c0_3, %c0_4] : memref<1x128xbf16, #tpu.memory_space<vmem>>, vector<1x128xbf16>
    %5 = arith.extf %4 : vector<1x128xbf16> to vector<1x128xf32>
    %6 = vector.broadcast %5 : vector<1x128xf32> to vector<8x128xf32>
    %7 = arith.addf %3, %6 : vector<8x128xf32>
    %cst_5 = arith.constant 0.000000e+00 : f32
    %8 = vector.broadcast %cst_5 : f32 to vector<8x128xf32>
    %9 = arith.maximumf %7, %8 : vector<8x128xf32>
    %c0_6 = arith.constant 0 : index
    %c0_7 = arith.constant 0 : index
    %10 = vector.load %arg4[%c0_6, %c0_7] : memref<128x64xbf16, #tpu.memory_space<vmem>>, vector<128x64xbf16>
    %11 = arith.extf %10 : vector<128x64xbf16> to vector<128x64xf32>
    %cst_8 = arith.constant dense<0.000000e+00> : vector<8x64xf32>
    %12 = tpu.matmul %9, %11, %cst_8 {dimension_numbers = #tpu.dot_dimension_numbers<[1], [0], [0], [1], [0, 0, 1, 1], [], []>} : vector<8x128xf32>, vector<128x64xf32>, vector<8x64xf32> -> vector<8x64xf32>
    %c0_9 = arith.constant 0 : index
    %c0_10 = arith.constant 0 : index
    %13 = vector.load %arg5[%c0_9, %c0_10] : memref<1x64xbf16, #tpu.memory_space<vmem>>, vector<1x64xbf16>
    %14 = arith.extf %13 : vector<1x64xbf16> to vector<1x64xf32>
    %15 = vector.broadcast %14 : vector<1x64xf32> to vector<8x64xf32>
    %16 = arith.addf %12, %15 : vector<8x64xf32>
    %cst_11 = arith.constant 0.000000e+00 : f32
    %17 = vector.broadcast %cst_11 : f32 to vector<8x64xf32>
    %18 = arith.maximumf %16, %17 : vector<8x64xf32>
    %c0_12 = arith.constant 0 : index
    %c0_13 = arith.constant 0 : index
    %19 = vector.load %arg6[%c0_12, %c0_13] : memref<64x32xbf16, #tpu.memory_space<vmem>>, vector<64x32xbf16>
    %20 = arith.extf %19 : vector<64x32xbf16> to vector<64x32xf32>
    %cst_14 = arith.constant dense<0.000000e+00> : vector<8x32xf32>
    %21 = tpu.matmul %18, %20, %cst_14 {dimension_numbers = #tpu.dot_dimension_numbers<[1], [0], [0], [1], [0, 0, 1, 1], [], []>} : vector<8x64xf32>, vector<64x32xf32>, vector<8x32xf32> -> vector<8x32xf32>
    %c0_15 = arith.constant 0 : index
    %c0_16 = arith.constant 0 : index
    %22 = vector.load %arg7[%c0_15, %c0_16] : memref<1x32xbf16, #tpu.memory_space<vmem>>, vector<1x32xbf16>
    %23 = arith.extf %22 : vector<1x32xbf16> to vector<1x32xf32>
    %24 = vector.broadcast %23 : vector<1x32xf32> to vector<8x32xf32>
    %25 = arith.addf %21, %24 : vector<8x32xf32>
    %cst_17 = arith.constant 0.000000e+00 : f32
    %26 = vector.broadcast %cst_17 : f32 to vector<8x32xf32>
    %27 = arith.maximumf %25, %26 : vector<8x32xf32>
    %c0_18 = arith.constant 0 : index
    %c0_19 = arith.constant 0 : index
    %28 = vector.load %arg8[%c0_18, %c0_19] : memref<32x8xbf16, #tpu.memory_space<vmem>>, vector<32x8xbf16>
    %29 = arith.extf %28 : vector<32x8xbf16> to vector<32x8xf32>
    %cst_20 = arith.constant dense<0.000000e+00> : vector<8x8xf32>
    %30 = tpu.matmul %27, %29, %cst_20 {dimension_numbers = #tpu.dot_dimension_numbers<[1], [0], [0], [1], [0, 0, 1, 1], [], []>} : vector<8x32xf32>, vector<32x8xf32>, vector<8x8xf32> -> vector<8x8xf32>
    %c0_21 = arith.constant 0 : index
    %c0_22 = arith.constant 0 : index
    %31 = vector.load %arg9[%c0_21, %c0_22] : memref<1x8xbf16, #tpu.memory_space<vmem>>, vector<1x8xbf16>
    %32 = arith.extf %31 : vector<1x8xbf16> to vector<1x8xf32>
    %33 = vector.broadcast %32 : vector<1x8xf32> to vector<8x8xf32>
    %34 = arith.addf %30, %33 : vector<8x8xf32>
    %35 = math.tanh %34 : vector<8x8xf32>
    %cst_23 = arith.constant 1.000000e+00 : f32
    %36 = vector.broadcast %cst_23 : f32 to vector<8x8xf32>
    %37 = arith.mulf %36, %35 : vector<8x8xf32>
    %c0_24 = arith.constant 0 : index
    %c0_25 = arith.constant 0 : index
    %38 = vector.load %arg10[%c0_24, %c0_25] : memref<8x8xf32, #tpu.memory_space<vmem>>, vector<8x8xf32>
    tpu.vector_store %arg10[%c0_24, %c0_25], %37 {strides = array<i32>} : memref<8x8xf32, #tpu.memory_space<vmem>>, vector<8x8xf32>,
    return
  }
  func.func @transform_0(%arg0: i32) -> (i32, i32) {
    %c0_i32 = arith.constant 0 : i32
    %c0_i32_0 = arith.constant 0 : i32
    return %arg0, %c0_i32 : i32, i32
  }
  func.func @transform_1(%arg0: i32) -> (i32, i32) {
    %c0_i32 = arith.constant 0 : i32
    %c0_i32_0 = arith.constant 0 : i32
    %c0_i32_1 = arith.constant 0 : i32
    return %c0_i32, %c0_i32_0 : i32, i32
  }
  func.func @transform_2(%arg0: i32) -> (i32, i32) {
    %c0_i32 = arith.constant 0 : i32
    %c0_i32_0 = arith.constant 0 : i32
    %c0_i32_1 = arith.constant 0 : i32
    return %c0_i32, %c0_i32_0 : i32, i32
  }
  func.func @transform_3(%arg0: i32) -> (i32, i32) {
    %c0_i32 = arith.constant 0 : i32
    %c0_i32_0 = arith.constant 0 : i32
    %c0_i32_1 = arith.constant 0 : i32
    return %c0_i32, %c0_i32_0 : i32, i32
  }
  func.func @transform_4(%arg0: i32) -> (i32, i32) {
    %c0_i32 = arith.constant 0 : i32
    %c0_i32_0 = arith.constant 0 : i32
    %c0_i32_1 = arith.constant 0 : i32
    return %c0_i32, %c0_i32_0 : i32, i32
  }
  func.func @transform_5(%arg0: i32) -> (i32, i32) {
    %c0_i32 = arith.constant 0 : i32
    %c0_i32_0 = arith.constant 0 : i32
    %c0_i32_1 = arith.constant 0 : i32
    return %c0_i32, %c0_i32_0 : i32, i32
  }
  func.func @transform_6(%arg0: i32) -> (i32, i32) {
    %c0_i32 = arith.constant 0 : i32
    %c0_i32_0 = arith.constant 0 : i32
    %c0_i32_1 = arith.constant 0 : i32
    return %c0_i32, %c0_i32_0 : i32, i32
  }
  func.func @transform_7(%arg0: i32) -> (i32, i32) {
    %c0_i32 = arith.constant 0 : i32
    %c0_i32_0 = arith.constant 0 : i32
    %c0_i32_1 = arith.constant 0 : i32
    return %c0_i32, %c0_i32_0 : i32, i32
  }
  func.func @transform_8(%arg0: i32) -> (i32, i32) {
    %c0_i32 = arith.constant 0 : i32
    %c0_i32_0 = arith.constant 0 : i32
    %c0_i32_1 = arith.constant 0 : i32
    return %c0_i32, %c0_i32_0 : i32, i32
  }
  func.func @transform_9(%arg0: i32) -> (i32, i32) {
    %c0_i32 = arith.constant 0 : i32
    %c0_i32_0 = arith.constant 0 : i32
    return %arg0, %c0_i32 : i32, i32
  }
}

</mosaic_0001>

<bundles_post_ra>
// kernel: tpu_custom_call.1
= control target key start
LH: loop header
LB: loop body
LE: loop exit
PB: predicated region body
PF: predicated region fallthrough
CT: control target
= control target key end

     0   :  { %v685_v1 = vmov 0.0|0.0   ;;  %vm686_vm0 = vmmov 0   ;;  %v687_v2 = vmov 0.0   ;;  %vm44_vm1 = vcmask 130048   ;;  %s834_s0 = inlined_call_operand.vmem [shape: f32[8,16], index: 0, kind: input, shape index: {}]   ;;  %s835_s1 = inlined_call_operand.vmem [shape: bf16[16,128], index: 1, kind: input, shape index: {}]   ;;  %s836_s2 = inlined_call_operand.vmem [shape: bf16[1,128], index: 2, kind: input, shape index: {}]   ;;  %s837_s3 = inlined_call_operand.vmem [shape: bf16[128,64], index: 3, kind: input, shape index: {}]   ;;  %s838_s4 = inlined_call_operand.vmem [shape: bf16[1,64], index: 4, kind: input, shape index: {}]   ;;  %s839_s5 = inlined_call_operand.vmem [shape: bf16[64,32], index: 5, kind: input, shape index: {}]   ;;  %s840_s6 = inlined_call_operand.vmem [shape: bf16[1,32], index: 6, kind: input, shape index: {}]   ;;  %s841_s7 = inlined_call_operand.vmem [shape: bf16[32,8], index: 7, kind: input, shape index: {}]   ;;  %s842_s8 = inlined_call_operand.vmem [shape: bf16[1,8], index: 8, kind: input, shape index: {}]   ;;  %s843_s9 = inlined_call_operand.hbm [shape: f32[8,8], index: 9, kind: output, shape index: {}]  }
   0x1   :  { %v434_v0 = vld [vmem:[%s835_s1] sm:$0xff]   ;;  %610 = vmatprep.subr.bf16.mxu0 %v685_v1  ;;  %542 = vmatprep.mubr.msk.f32.mxu0 %vm686_vm0, %v687_v2 }
   0x2   :  { %v438_v3 = vld [vmem:[%s837_s3] sm:$0xff]   ;;  %612 = vmatpush3.bf16.msra.mxu0 %v434_v0  ;;  %613 = vmatprep.subr.bf16.mxu1 %v685_v1 }
   0x3   :  { %v33_v4 = vld [vmem:[%s834_s0] sm:$0xff]  ;;  %615 = vmatpush3.bf16.msra.mxu1 %v438_v3  ;;  %577 = vmatprep.mubr.msk.f32.mxu1 %vm686_vm0, %v687_v2 }
   0x4   :  { %14 = vsyncpa [#allocation3], 0  ;;  %616 = vmatprep.subr.bf16.mxu1 %v685_v1  ;;  %v493_v5 = vld [vmem:[%s837_s3 + $0x8] sm:$0xff]   ;;  %637 = vmatprep.subr.bf16.mxu0 %v685_v1  ;;  %v494_v6 = vld [vmem:[%s837_s3 + $0x10] sm:$0xff]   ;;  %v40_v15 = vlaneseq  ;;  %vm250_vm2 = vcmask 523264   ;;  %vm339_vm3 = vcmask 261120  }
   0x5   :  { %543 = vmatmul.mubr.msk.f32.vlgmr.msra.gmra.mrb[0].mxu0 %vm44_vm1, %v33_v4  ;;  %v495_v7 = vld [vmem:[%s837_s3 + $0x18] sm:$0xff]   ;;  %v496_v8 = vld [vmem:[%s837_s3 + $0x20] sm:$0xff]   ;;  %v497_v9 = vld [vmem:[%s837_s3 + $0x28] sm:$0xff]   ;;  %vm414_vm4 = vcmask 64512  }
   0x6   :  { %596 = vmatprep.mubr.msk.f32.mxu0 %vm686_vm0, %v687_v2  ;;  %v498_v10 = vld [vmem:[%s837_s3 + $0x30] sm:$0xff]   ;;  %v499_v11 = vld [vmem:[%s837_s3 + $0x38] sm:$0xff]   ;;  %v470_v12 = vld [vmem:[%s839_s5] sm:$0xff]   ;;  %v41_v16 = vshrl.u32 %v40_v15, 7 }
   0x7   :  { %618 = vmatpush3.bf16.msra.mxu1 %v493_v5  ;;  %639 = vmatpush3.bf16.msra.mxu0 %v470_v12  ;;  %v500_v13 = vld [vmem:[%s839_s5 + $0x8] sm:$0xff]   ;;  %v501_v14 = vld [vmem:[%s839_s5 + $0x10] sm:$0xff]   ;;  %v38_v17 = vld [vmem:[%s836_s2] sm:$0x1] }
   0x8   :  { %619 = vmatprep.subr.bf16.mxu1 %v685_v1  ;;  %640 = vmatprep.subr.bf16.mxu0 %v685_v1  ;;  %v39_v18 = vunpack.c.l.bf16 %v38_v17  ;;  %v42_v19 = vsub.s32 0, %v41_v16  ;;  %v502_v25 = vld [vmem:[%s839_s5 + $0x18] sm:$0xff]   ;;  %v151_v26 = vld [vmem:[%s838_s4] sm:$0x1]  ;;  %v503_v34 = vld [vmem:[%s841_s7 + $0x8] sm:$0xff]  }
   0x9   :  { %v152_v27 = vunpack.c.l.bf16 %v151_v26  ;;  %v486_v33 = vld [vmem:[%s841_s7] sm:$0xff]   ;;  %s688_s7 = smov [#allocation2]  }
   0xa   :  { %v43_v20 = vrot.slane %v39_v18, %v42_v19  ;;  %v244_v35 = vld [vmem:[%s840_s6] sm:$0x1]  ;;  %s422_s6 = sshll.u32 %s688_s7, 4  ;;  %s423_s6 = int_to_ptr.vmem [resolvable:$true] %s422_s6 }
   0xb   :  { %621 = vmatpush3.bf16.msra.mxu1 %v494_v6  ;;  %642 = vmatpush3.bf16.msra.mxu0 %v500_v13  ;;  %v156_v28 = vrot.slane %v152_v27, %v42_v19  ;;  %v245_v36 = vunpack.c.l.bf16 %v244_v35  ;;  %v333_v42 = vld [vmem:[%s842_s8] sm:$0x1]  ;;  %s661_s20 = scalar_lea.vmem %s423_s6, 128  ;;  %p666_p1 = scmp.lt.s32.totalorder %s423_s6, %s423_s6 }
   0xc   :  { %622 = vmatprep.subr.bf16.mxu1 %v685_v1  ;;  %643 = vmatprep.subr.bf16.mxu0 %v685_v1  ;;  %v334_v43 = vunpack.c.l.bf16 %v333_v42  ;;  %p662_p0 = scmp.ne.s32.totalorder %s423_s6, %s661_s20  ;;  %p667_p2 = scmp.lt.s32.totalorder %s661_s20, %s661_s20 }
   0xd   :  { %v249_v37 = vrot.slane %v245_v36, %v42_v19 }
   0xe   :  { %v338_v44 = vrot.slane %v334_v43, %v42_v19  ;;  %p668_p3 = por %p667_p2, %p666_p1 }
   0xf   :  { %624 = vmatpush3.bf16.msra.mxu1 %v495_v7  ;;  %645 = vmatpush3.bf16.msra.mxu0 %v501_v14 }
  0x10   :  { %625 = vmatprep.subr.bf16.mxu1 %v685_v1  ;;  %646 = vmatprep.subr.bf16.mxu0 %v685_v1  ;;  %p669_p4 = pnand %p668_p3, %p662_p0 }
  0x13   :  { %627 = vmatpush3.bf16.msra.mxu1 %v496_v8  ;;  %648 = vmatpush3.bf16.msra.mxu0 %v502_v25 }
  0x14   :  { %628 = vmatprep.subr.bf16.mxu1 %v685_v1  ;;  %649 = vmatprep.subr.bf16.mxu0 %v685_v1 }
  0x17   :  { %630 = vmatpush3.bf16.msra.mxu1 %v497_v9 }
  0x18   :  { %631 = vmatprep.subr.bf16.mxu1 %v685_v1 }
  0x1b   :  { %633 = vmatpush3.bf16.msra.mxu1 %v498_v10 }
  0x1c   :  { %634 = vmatprep.subr.bf16.mxu1 %v685_v1 }
  0x1f   :  { %636 = vmatpush3.bf16.msra.mxu1 %v499_v11 }
  0xd8   :  { %v114_v21 = vpop.f32.mrb[0].mxu0 }
  0xd9   :  { %v115_v22 = vadd.f32 %v114_v21, %v43_v20  ;;  %v544_v23 = vpop.f32.mrb[1].mxu0 }
  0xdb   :  { %v118_v24 = vmax.f32 %v115_v22, 0.0 }
  0xdd   :  { %578 = vmatmul.mubr.f32.vlgmr.msra.gmra.mrb[0].mxu1 %v118_v24 }
 0x1b0   :  { %v223_v29 = vpop.f32.mrb[0].mxu1 }
 0x1b1   :  { %v224_v30 = vadd.f32 %v223_v29, %v156_v28  ;;  %v579_v31 = vpop.f32.mrb[1].mxu1 }
 0x1b3   :  { %v227_v32 = vmax.f32 %v224_v30, 0.0 }
 0x1b5   :  { %597 = vmatmul.mubr.msk.f32.vlgmr.msra.gmra.mrb[2].mxu0 %vm250_vm2, %v227_v32 }
 0x1b6   :  { %651 = vmatpush3.bf16.msra.mxu0 %v486_v33  ;;  %607 = vmatprep.mubr.msk.f32.mxu0 %vm686_vm0, %v687_v2 }
 0x1b7   :  { %652 = vmatprep.subr.bf16.mxu0 %v685_v1 }
 0x1ba   :  { %654 = vmatpush3.bf16.msra.mxu0 %v503_v34 }
 0x288   :  { %v320_v38 = vpop.f32.mrb[2].mxu0 }
 0x289   :  { %v321_v39 = vadd.f32 %v320_v38, %v249_v37  ;;  %v598_v40 = vpop.f32.mrb[3].mxu0 }
 0x28b   :  { %v324_v41 = vmax.f32 %v321_v39, 0.0 }
 0x28d   :  { %608 = vmatmul.mubr.msk.f32.vlgmr.msra.gmra.mrb[4].mxu0 %vm339_vm3, %v324_v41 }
 0x360   :  { %v409_v45 = vpop.f32.mrb[4].mxu0 }
 0x361   :  { %v410_v46 = vadd.f32 %v409_v45, %v338_v44  ;;  %v609_v47 = vpop.f32.mrb[5].mxu0 }
 0x363   :  { %659 = vtanh.f32 %v410_v46 }
 0x36d   :  { %v660_v48 = vpop.eup %659 }
 0x36e   :  { %415 = vst.msk [vmem:[#allocation2] sm:$0xff] %vm414_vm4, %v660_v48 }
 0x36f   :  { %672 = shalt.err (!%p669_p4)
}
 0x370   :  { %s673_s22 = scalar_lea.hbm %s843_s9, 128 }
 0x371   :  { %p674_p5 = scmp.ne.s32.totalorder %s843_s9, %s673_s22  ;;  %p677_p6 = scmp.lt.u32.totalorder %s673_s22, %s843_s9 }
 0x373   :  { %p679_p7 = pnand %p677_p6, %p674_p5 }
 0x375   :  { %682 = shalt.err (!%p679_p7)
}
 0x376   :  { %425 = dma.vmem_to_hbm [thread:$0]  %s423_s6, 128, %s843_s9, [#allocation3]  }
 0x377   :  { %683 = dma.done.wait [#allocation3], 128  }
 0x378   :  { %684 = vsyncadd [#allocation3], 4294967168 }
 0x379   :  { %429 = vsyncpa [#allocation3], 1 }

</bundles_post_ra>
